<compile_context>
chip_gen: v7x
topology: tpu7x:2x2x1
jax: 0.10.0
libtpu: 0.0.40
codegen_flags: <defaults>
</compile_context>

<pallas_src>
import functools

import jax
import jax.numpy as jnp
from jax.experimental import pallas as pl
from jax.experimental.pallas import tpu as pltpu  # noqa: F401  (kept for CompilerParams when scaling)


def bahdanau_kernel(enc_ref, dec_ref, we_ref, wd_ref, prm_ref, awe_ref, alpha_ref,
                    *, B, P, P_pad):
    # enc_ref : (B*P, E) flattened encoder_out
    # dec_ref : (B, D)   decoder hidden state
    # prm_ref : (4, A)   packed [b_enc; b_dec; w_full; b_full (lane-broadcast)]
    A = we_ref.shape[1]
    E = enc_ref.shape[1]

    prm = prm_ref[...]                                 # single small load
    be = prm[0:1, :]                                   # (1, A)
    bd = prm[1:2, :]                                   # (1, A)
    wf = prm[2:3, :].reshape(1, 1, A)                  # (1, 1, A)
    bf = prm[3:4, 0:1]                                 # (1, 1)

    e_flat = enc_ref[...]                                                       # (B*P, E)

    # att1 = encoder_att(encoder_out): one wide MXU matmul over all batches/pixels.
    att1 = jnp.dot(e_flat, we_ref[...], preferred_element_type=jnp.float32) + be     # (B*P, A)

    # att2 = decoder_att(decoder_hidden): computed once for the whole batch.
    att2 = jnp.dot(dec_ref[...], wd_ref[...], preferred_element_type=jnp.float32) + bd  # (B, A)

    # relu(att1 + att2.unsqueeze(1)); P is a multiple of the sublane tile (8) so the reshape is a relabel.
    x = jnp.maximum(att1.reshape(B, P, A) + att2[:, None, :], 0.0)              # (B, P, A)

    # full_att(...).squeeze(2): single-output-column projection on VPU (mul) + XLU (lane reduce),
    # keeping the MXU free of N=1 pushes.
    scores = jnp.sum(x * wf, axis=-1) + bf                                      # (B, P)

    # softmax over the pixel axis (torch dim=1)
    m = jnp.max(scores, axis=-1, keepdims=True)                                 # (B, 1)
    p = jnp.exp(scores - m)                                                     # (B, P)
    denom = jnp.sum(p, axis=-1, keepdims=True)                                  # (B, 1)
    r = pl.reciprocal(denom, approx=True)                                       # EUP slot
    r = r * (2.0 - denom * r)                                                   # one Newton step -> ~exact 1/denom
    alpha = p * r                                                               # (B, P)

    # Lane-dense alpha store: write the full (B, P_pad) slab (unmasked vst); wrapper slices to (B, P).
    if P_pad > P:
        alpha_ref[...] = jnp.concatenate(
            [alpha, jnp.zeros((B, P_pad - P), jnp.float32)], axis=-1)
    else:
        alpha_ref[...] = alpha

    # attention_weighted_encoding = sum_P(encoder_out * alpha)
    e3 = e_flat.reshape(B, P, E)                                                # relabel (P multiple of 8)
    awe_ref[...] = jnp.sum(e3 * alpha[:, :, None], axis=1)                      # (B, E)


@jax.jit
def bahdanau_attention(encoder_out, decoder_hidden, We, be, Wd, bd, wf, bf):
    B, P, E = encoder_out.shape
    D = decoder_hidden.shape[1]
    A = We.shape[1]
    P_pad = ((P + 127) // 128) * 128            # lane-dense width for the alpha slab

    enc_flat = encoder_out.reshape(B * P, E)    # free relabel at the XLA level

    # Pack the four tiny parameter vectors into one (4, A) slab -> one DMA instead of four.
    params = jnp.stack(
        [be, bd, wf, jnp.broadcast_to(bf, (A,))], axis=0).astype(jnp.float32)   # (4, A)

    kernel = functools.partial(bahdanau_kernel, B=B, P=P, P_pad=P_pad)

    awe, alpha_pad = pl.pallas_call(
        kernel,
        out_shape=(
            jax.ShapeDtypeStruct((B, E), jnp.float32),
            jax.ShapeDtypeStruct((B, P_pad), jnp.float32),
        ),
        # No grid: whole problem (~260 KiB) is resident in VMEM for a single invocation.
        in_specs=[
            pl.BlockSpec((B * P, E), lambda: (0, 0)),   # encoder_out (flattened)
            pl.BlockSpec((B, D), lambda: (0, 0)),       # decoder_hidden
            pl.BlockSpec((E, A), lambda: (0, 0)),       # W_enc
            pl.BlockSpec((D, A), lambda: (0, 0)),       # W_dec
            pl.BlockSpec((4, A), lambda: (0, 0)),       # packed [b_enc; b_dec; w_full; b_full]
        ],
        out_specs=(
            pl.BlockSpec((B, E), lambda: (0, 0)),       # attention_weighted_encoding
            pl.BlockSpec((B, P_pad), lambda: (0, 0)),   # alpha (lane-dense padded slab)
        ),
    )(enc_flat, decoder_hidden, We, Wd, params)

    return awe, alpha_pad[:, :P]


def bahdanau_reference(encoder_out, decoder_hidden, We, be, Wd, bd, wf, bf):
    hp = jax.lax.Precision.HIGHEST
    att1 = jnp.matmul(encoder_out, We, precision=hp) + be          # (B, P, A)
    att2 = jnp.matmul(decoder_hidden, Wd, precision=hp) + bd       # (B, A)
    x = jnp.maximum(att1 + att2[:, None, :], 0.0)                  # (B, P, A)
    att = jnp.matmul(x, wf.reshape(-1, 1), precision=hp)[..., 0] + bf   # (B, P)
    alpha = jax.nn.softmax(att, axis=1)                            # (B, P)
    awe = (encoder_out * alpha[..., None]).sum(axis=1)             # (B, E)
    return awe, alpha


if __name__ == "__main__":
    # Small, deterministic shapes consistent with the module's forward pass.
    B, P = 2, 16            # batch, num pixels (spatial locations)
    encoder_dim, decoder_dim, attention_dim = 256, 128, 128

    key = jax.random.PRNGKey(0)
    ks = jax.random.split(key, 8)

    encoder_out = jax.random.normal(ks[0], (B, P, encoder_dim), dtype=jnp.float32)
    decoder_hidden = jax.random.normal(ks[1], (B, decoder_dim), dtype=jnp.float32)

    # Parameters stored pre-transposed as (in_dim, out_dim) so the kernel does x @ W + b,
    # equivalent to torch's x @ W.T + b with W of shape (out, in).
    We = jax.random.normal(ks[2], (encoder_dim, attention_dim), dtype=jnp.float32) * 0.02
    be = jax.random.normal(ks[3], (attention_dim,), dtype=jnp.float32) * 0.02
    Wd = jax.random.normal(ks[4], (decoder_dim, attention_dim), dtype=jnp.float32) * 0.02
    bd = jax.random.normal(ks[5], (attention_dim,), dtype=jnp.float32) * 0.02
    wf = jax.random.normal(ks[6], (attention_dim,), dtype=jnp.float32) * 0.02
    bf = jax.random.normal(ks[7], (1,), dtype=jnp.float32) * 0.02

    awe, alpha = bahdanau_attention(encoder_out, decoder_hidden, We, be, Wd, bd, wf, bf)
    jax.block_until_ready((awe, alpha))

    awe_ref, alpha_ref = bahdanau_reference(encoder_out, decoder_hidden, We, be, Wd, bd, wf, bf)

    assert awe.shape == (B, encoder_dim) and alpha.shape == (B, P)
    # Newton-refined reciprocal restores ~exact softmax normalization -> tolerances tightened to 1e-4.
    assert jnp.allclose(awe, awe_ref, atol=1e-4, rtol=1e-4)
    assert jnp.allclose(alpha, alpha_ref, atol=1e-4, rtol=1e-4)

    print("KERNEL_OK")
</pallas_src>

<mosaic_0001>
module attributes {stable_mosaic.version = 11 : i64} {
  func.func @bahdanau_kernel(%arg0: memref<32x256xf32, #tpu.memory_space<vmem>>, %arg1: memref<2x128xf32, #tpu.memory_space<vmem>>, %arg2: memref<256x128xf32, #tpu.memory_space<vmem>>, %arg3: memref<128x128xf32, #tpu.memory_space<vmem>>, %arg4: memref<4x128xf32, #tpu.memory_space<vmem>>, %arg5: memref<2x256xf32, #tpu.memory_space<vmem>>, %arg6: memref<2x128xf32, #tpu.memory_space<vmem>>) attributes {dimension_semantics = [], scalar_prefetch = 0 : i64, scratch_operands = 0 : i64, tpu.core_type = #tpu.core_type<tc>} {
    %c0 = arith.constant 0 : index
    %c0_0 = arith.constant 0 : index
    %0 = vector.load %arg4[%c0, %c0_0] : memref<4x128xf32, #tpu.memory_space<vmem>>, vector<4x128xf32>
    %1 = vector.extract_strided_slice %0 {offsets = [0, 0], sizes = [1, 128], strides = [1, 1]} : vector<4x128xf32> to vector<1x128xf32>
    %2 = vector.extract_strided_slice %0 {offsets = [1, 0], sizes = [1, 128], strides = [1, 1]} : vector<4x128xf32> to vector<1x128xf32>
    %3 = vector.extract_strided_slice %0 {offsets = [2, 0], sizes = [1, 128], strides = [1, 1]} : vector<4x128xf32> to vector<1x128xf32>
    %4 = vector.shape_cast %3 : vector<1x128xf32> to vector<1x1x128xf32>
    %5 = vector.extract_strided_slice %0 {offsets = [3, 0], sizes = [1, 1], strides = [1, 1]} : vector<4x128xf32> to vector<1x1xf32>
    %c0_1 = arith.constant 0 : index
    %c0_2 = arith.constant 0 : index
    %6 = vector.load %arg0[%c0_1, %c0_2] : memref<32x256xf32, #tpu.memory_space<vmem>>, vector<32x256xf32>
    %c0_3 = arith.constant 0 : index
    %c0_4 = arith.constant 0 : index
    %7 = vector.load %arg2[%c0_3, %c0_4] : memref<256x128xf32, #tpu.memory_space<vmem>>, vector<256x128xf32>
    %cst = arith.constant dense<0.000000e+00> : vector<32x128xf32>
    %8 = tpu.matmul %6, %7, %cst {dimension_numbers = #tpu.dot_dimension_numbers<[1], [0], [0], [1], [0, 0, 1, 1], [], []>} : vector<32x256xf32>, vector<256x128xf32>, vector<32x128xf32> -> vector<32x128xf32>
    %9 = vector.broadcast %1 : vector<1x128xf32> to vector<32x128xf32>
    %10 = arith.addf %8, %9 : vector<32x128xf32>
    %c0_5 = arith.constant 0 : index
    %c0_6 = arith.constant 0 : index
    %11 = vector.load %arg1[%c0_5, %c0_6] : memref<2x128xf32, #tpu.memory_space<vmem>>, vector<2x128xf32>
    %c0_7 = arith.constant 0 : index
    %c0_8 = arith.constant 0 : index
    %12 = vector.load %arg3[%c0_7, %c0_8] : memref<128x128xf32, #tpu.memory_space<vmem>>, vector<128x128xf32>
    %cst_9 = arith.constant dense<0.000000e+00> : vector<2x128xf32>
    %13 = tpu.matmul %11, %12, %cst_9 {dimension_numbers = #tpu.dot_dimension_numbers<[1], [0], [0], [1], [0, 0, 1, 1], [], []>} : vector<2x128xf32>, vector<128x128xf32>, vector<2x128xf32> -> vector<2x128xf32>
    %14 = vector.broadcast %2 : vector<1x128xf32> to vector<2x128xf32>
    %15 = arith.addf %13, %14 : vector<2x128xf32>
    %16 = vector.shape_cast %10 : vector<32x128xf32> to vector<2x16x128xf32>
    %17 = vector.shape_cast %15 : vector<2x128xf32> to vector<2x1x128xf32>
    %18 = vector.broadcast %17 : vector<2x1x128xf32> to vector<2x16x128xf32>
    %19 = arith.addf %16, %18 : vector<2x16x128xf32>
    %cst_10 = arith.constant 0.000000e+00 : f32
    %20 = vector.broadcast %cst_10 : f32 to vector<2x16x128xf32>
    %21 = arith.maximumf %19, %20 : vector<2x16x128xf32>
    %22 = vector.broadcast %4 : vector<1x1x128xf32> to vector<2x16x128xf32>
    %23 = arith.mulf %21, %22 : vector<2x16x128xf32>
    %cst_11 = arith.constant dense<0.000000e+00> : vector<2x16xf32>
    %24 = vector.multi_reduction <add>, %23, %cst_11 [2] : vector<2x16x128xf32> to vector<2x16xf32>
    %25 = vector.broadcast %5 : vector<1x1xf32> to vector<2x16xf32>
    %26 = arith.addf %24, %25 : vector<2x16xf32>
    %cst_12 = arith.constant dense<0xFF800000> : vector<2xf32>
    %27 = vector.multi_reduction <maximumf>, %26, %cst_12 [1] : vector<2x16xf32> to vector<2xf32>
    %28 = vector.shape_cast %27 : vector<2xf32> to vector<2x1xf32>
    %29 = vector.broadcast %28 : vector<2x1xf32> to vector<2x16xf32>
    %30 = arith.subf %26, %29 : vector<2x16xf32>
    %31 = math.exp %30 : vector<2x16xf32>
    %cst_13 = arith.constant dense<0.000000e+00> : vector<2xf32>
    %32 = vector.multi_reduction <add>, %31, %cst_13 [1] : vector<2x16xf32> to vector<2xf32>
    %33 = vector.shape_cast %32 : vector<2xf32> to vector<2x1xf32>
    %34 = tpu.reciprocal %33 {approx = true} : vector<2x1xf32> -> vector<2x1xf32>
    %35 = arith.mulf %33, %34 : vector<2x1xf32>
    %cst_14 = arith.constant 2.000000e+00 : f32
    %36 = vector.broadcast %cst_14 : f32 to vector<2x1xf32>
    %37 = arith.subf %36, %35 : vector<2x1xf32>
    %38 = arith.mulf %34, %37 : vector<2x1xf32>
    %39 = vector.broadcast %38 : vector<2x1xf32> to vector<2x16xf32>
    %40 = arith.mulf %31, %39 : vector<2x16xf32>
    %cst_15 = arith.constant 0.000000e+00 : f32
    %41 = vector.broadcast %cst_15 : f32 to vector<2x112xf32>
    %42 = tpu.concatenate %40, %41 in 1 : vector<2x16xf32>, vector<2x112xf32> -> vector<2x128xf32>
    %c0_16 = arith.constant 0 : index
    %c0_17 = arith.constant 0 : index
    %43 = vector.load %arg6[%c0_16, %c0_17] : memref<2x128xf32, #tpu.memory_space<vmem>>, vector<2x128xf32>
    tpu.vector_store %arg6[%c0_16, %c0_17], %42 {strides = array<i32>} : memref<2x128xf32, #tpu.memory_space<vmem>>, vector<2x128xf32>,
    %44 = vector.shape_cast %6 : vector<32x256xf32> to vector<2x16x256xf32>
    %45 = vector.shape_cast %40 : vector<2x16xf32> to vector<2x16x1xf32>
    %46 = vector.broadcast %45 : vector<2x16x1xf32> to vector<2x16x256xf32>
    %47 = arith.mulf %44, %46 : vector<2x16x256xf32>
    %cst_18 = arith.constant dense<0.000000e+00> : vector<2x256xf32>
    %48 = vector.multi_reduction <add>, %47, %cst_18 [1] : vector<2x16x256xf32> to vector<2x256xf32>
    %c0_19 = arith.constant 0 : index
    %c0_20 = arith.constant 0 : index
    %49 = vector.load %arg5[%c0_19, %c0_20] : memref<2x256xf32, #tpu.memory_space<vmem>>, vector<2x256xf32>
    tpu.vector_store %arg5[%c0_19, %c0_20], %48 {strides = array<i32>} : memref<2x256xf32, #tpu.memory_space<vmem>>, vector<2x256xf32>,
    return
  }
}

</mosaic_0001>

<bundles_post_ra>
// kernel: bahdanau_attention.1
= control target key start
LH: loop header
LB: loop body
LE: loop exit
PB: predicated region body
PF: predicated region fallthrough
CT: control target
= control target key end

     0   :  { %12 = vsyncpa [#allocation3], 0  ;;  %s1119_s0 = inlined_call_operand.hbm [shape: f32[32,256], index: 0, kind: input, shape index: {}]   ;;  %s1120_s1 = inlined_call_operand.vmem [shape: f32[2,128], index: 1, kind: input, shape index: {}]   ;;  %s1121_s2 = inlined_call_operand.hbm [shape: f32[256,128], index: 2, kind: input, shape index: {}]   ;;  %s1122_s3 = inlined_call_operand.hbm [shape: f32[128,128], index: 3, kind: input, shape index: {}]   ;;  %s1123_s4 = inlined_call_operand.vmem [shape: f32[4,128], index: 4, kind: input, shape index: {}]   ;;  %s1124_s5 = inlined_call_operand.hbm [shape: f32[2,256], index: 5, kind: output, shape index: {0}]   ;;  %s1125_s6 = inlined_call_operand.hbm [shape: f32[2,128], index: 6, kind: output, shape index: {1}]  }
   0x1   :  { %13 = vsyncpa [#allocation6], 0 }
   0x2   :  { %14 = vsyncpa [#allocation4], 0 }
   0x3   :  { %15 = vsyncpa [#allocation10], 0  ;;  %s908_s21 = smov [#allocation5]   ;;  %s790_s25 = scalar_lea.hbm %s1121_s2, 4096 }
   0x4   :  { %s35_s22 = sshll.u32 %s908_s21, 4  ;;  %p791_p0 = scmp.ne.s32.totalorder %s1121_s2, %s790_s25  ;;  %s36_s22 = int_to_ptr.vmem [resolvable:$true] %s35_s22 }
   0x5   :  { %p794_p1 = scmp.lt.u32.totalorder %s790_s25, %s1121_s2 }
   0x7   :  { %p796_p2 = pnand %p794_p1, %p791_p0 }
   0x9   :  { %799 = shalt.err (!%p796_p2)
}
   0xa   :  { %s800_s30 = scalar_lea.vmem %s36_s22, 4096  ;;  %p805_p4 = scmp.lt.s32.totalorder %s36_s22, %s36_s22 }
   0xb   :  { %p801_p3 = scmp.ne.s32.totalorder %s36_s22, %s800_s30  ;;  %p806_p5 = scmp.lt.s32.totalorder %s800_s30, %s800_s30 }
   0xd   :  { %p807_p6 = por %p806_p5, %p805_p4 }
   0xf   :  { %p808_p7 = pnand %p807_p6, %p801_p3 }
  0x11   :  { %811 = shalt.err (!%p808_p7)
}
  0x12   :  { %s909_s7 = smov 128   ;;  %s910_s8 = smov 8  }
  0x13   :  { %41 = dma.hbm_to_vmem [thread:$0]  %s1121_s2, 4096, %s36_s22, [#allocation6], %s909_s7, %s909_s7, %s910_s8  }
  0x14   :  { %s911_s11 = smov [#allocation2]   ;;  %s812_s15 = scalar_lea.hbm %s1119_s0, 1024 }
  0x15   :  { %s21_s12 = sshll.u32 %s911_s11, 4  ;;  %p813_p8 = scmp.ne.s32.totalorder %s1119_s0, %s812_s15  ;;  %s22_s12 = int_to_ptr.vmem [resolvable:$true] %s21_s12 }
  0x16   :  { %p816_p9 = scmp.lt.u32.totalorder %s812_s15, %s1119_s0 }
  0x18   :  { %p818_p10 = pnand %p816_p9, %p813_p8 }
  0x1a   :  { %821 = shalt.err (!%p818_p10)
}
  0x1b   :  { %s822_s20 = scalar_lea.vmem %s22_s12, 1024  ;;  %p827_p12 = scmp.lt.s32.totalorder %s22_s12, %s22_s12 }
  0x1c   :  { %p823_p11 = scmp.ne.s32.totalorder %s22_s12, %s822_s20  ;;  %p828_p13 = scmp.lt.s32.totalorder %s822_s20, %s822_s20 }
  0x1e   :  { %p829_p0 = por %p828_p13, %p827_p12 }
  0x20   :  { %p830_p1 = pnand %p829_p0, %p823_p11 }
  0x22   :  { %833 = shalt.err (!%p830_p1)
}
  0x23   :  { %s912_s2 = smov 256   ;;  %s913_s21 = smov 16  }
  0x24   :  { %27 = dma.hbm_to_vmem [thread:$0]  %s1119_s0, 1024, %s22_s12, [#allocation3], %s912_s2, %s912_s2, %s913_s21  }
  0x25   :  { %s914_s24 = smov [#allocation7]   ;;  %s834_s28 = scalar_lea.hbm %s1122_s3, 2048 }
  0x26   :  { %s47_s25 = sshll.u32 %s914_s24, 4  ;;  %p835_p2 = scmp.ne.s32.totalorder %s1122_s3, %s834_s28  ;;  %s48_s25 = int_to_ptr.vmem [resolvable:$true] %s47_s25 }
  0x27   :  { %p838_p3 = scmp.lt.u32.totalorder %s834_s28, %s1122_s3 }
  0x29   :  { %p840_p4 = pnand %p838_p3, %p835_p2 }
  0x2b   :  { %843 = shalt.err (!%p840_p4)
}
  0x2c   :  { %s844_s11 = scalar_lea.vmem %s48_s25, 2048  ;;  %p849_p6 = scmp.lt.s32.totalorder %s48_s25, %s48_s25 }
  0x2d   :  { %p845_p5 = scmp.ne.s32.totalorder %s48_s25, %s844_s11  ;;  %p850_p7 = scmp.lt.s32.totalorder %s844_s11, %s844_s11 }
  0x2f   :  { %p851_p8 = por %p850_p7, %p849_p6 }
  0x31   :  { %p852_p9 = pnand %p851_p8, %p845_p5 }
  0x33   :  { %855 = shalt.err (!%p852_p9)
}
  0x34   :  { %53 = dma.hbm_to_vmem [thread:$0]  %s1122_s3, 2048, %s48_s25, [#allocation6], %s909_s7, %s909_s7, %s910_s8  }
  0x35   :  { %900 = dma.done.wait [#allocation3], 1024  }
  0x36   :  { %901 = vsyncadd [#allocation3], 4294966272 }
  0x37   :  { %902 = dma.done.wait [#allocation6], 6144  }
  0x38   :  { %903 = vsyncadd [#allocation6], 4294961152  ;;  %v915_v0 = vmov 0.0|0.0   ;;  %vm916_vm0 = vmmov 0   ;;  %v917_v1 = vmov 0.0   ;;  %v90_v2 = vld [vmem:[#allocation5 + $0x80] sm:$0xff] }
  0x39   :  { %737 = vmatprep.subr.bf16.mxu1 %v915_v0  ;;  %702 = vmatprep.mubr.msk.f32.mxu1 %vm916_vm0, %v917_v1  ;;  %v91_v3 = vld [vmem:[#allocation5 + $0x88] sm:$0xff]  ;;  %v196_v4 = vld [vmem:[#allocation7] sm:$0xff]  ;;  %v92_v11 = vld [vmem:[#allocation5 + $0x90] sm:$0xff]  ;;  %vm367_vm1 = vcmask 130112   ;;  %vm378_vm2 = vcmask 1041409   ;;  %vm381_vm3 = vcmask 123904  }
  0x3a   :  { %v705_v5 = vpack.c.bf16 %v91_v3, %v90_v2  ;;  %v197_v6 = vld [vmem:[#allocation7 + $0x8] sm:$0xff]  ;;  %v74_v7 = vld [vmem:[#allocation5] sm:$0xff]  ;;  %v93_v12 = vld [vmem:[#allocation5 + $0x98] sm:$0xff]  ;;  %s920_s13 = smov [#allocation9]   ;;  %vm502_vm4 = vcmask 130048  }
  0x3b   :  { %v75_v8 = vld [vmem:[#allocation5 + $0x8] sm:$0xff]  ;;  %v738_v9 = vpack.c.bf16 %v197_v6, %v196_v4  ;;  %v198_v13 = vld [vmem:[#allocation7 + $0x10] sm:$0xff]  ;;  %v709_v14 = vpack.c.bf16 %v93_v12, %v92_v11  ;;  %v199_v15 = vld [vmem:[#allocation7 + $0x18] sm:$0xff]  ;;  %s595_s14 = sshll.u32 %s920_s13, 4  ;;  %s596_s14 = int_to_ptr.vmem [resolvable:$true] %s595_s14 }
  0x3c   :  { %v707_v10 = vpack.c.bf16 %v75_v8, %v74_v7  ;;  %706 = vmatprep.subr.bf16.mxu0 %v705_v5  ;;  %v76_v16 = vld [vmem:[#allocation5 + $0x10] sm:$0xff]  ;;  %v77_v17 = vld [vmem:[#allocation5 + $0x18] sm:$0xff]  ;;  %v741_v18 = vpack.c.bf16 %v199_v15, %v198_v13  ;;  %v94_v20 = vld [vmem:[#allocation5 + $0xa0] sm:$0xff]  ;;  %s856_s15 = scalar_lea.vmem %s596_s14, 32  ;;  %p861_p11 = scmp.lt.s32.totalorder %s596_s14, %s596_s14 }
  0x3d   :  { %739 = vmatpush3.bf16.msra.mxu1 %v738_v9  ;;  %v711_v19 = vpack.c.bf16 %v77_v17, %v76_v16  ;;  %v95_v21 = vld [vmem:[#allocation5 + $0xa8] sm:$0xff]  ;;  %v200_v22 = vld [vmem:[#allocation7 + $0x20] sm:$0xff]  ;;  %v96_v27 = vld [vmem:[#allocation5 + $0xb0] sm:$0xff]  ;;  %p857_p10 = scmp.ne.s32.totalorder %s596_s14, %s856_s15  ;;  %p862_p12 = scmp.lt.s32.totalorder %s856_s15, %s856_s15 }
  0x3e   :  { %708 = vmatpush3.bf16.msra.mxu0 %v707_v10  ;;  %740 = vmatprep.subr.bf16.mxu1 %v915_v0  ;;  %v713_v23 = vpack.c.bf16 %v95_v21, %v94_v20  ;;  %v201_v24 = vld [vmem:[#allocation7 + $0x28] sm:$0xff]  ;;  %v78_v25 = vld [vmem:[#allocation5 + $0x20] sm:$0xff]  ;;  %v97_v28 = vld [vmem:[#allocation5 + $0xb8] sm:$0xff]  ;;  %v106_v21 = vlaneseq }
  0x3f   :  { %710 = vmatprep.subr.bf16.mxu0 %v709_v14  ;;  %v79_v26 = vld [vmem:[#allocation5 + $0x28] sm:$0xff]  ;;  %v744_v29 = vpack.c.bf16 %v201_v24, %v200_v22  ;;  %v202_v31 = vld [vmem:[#allocation7 + $0x30] sm:$0xff]  ;;  %v717_v32 = vpack.c.bf16 %v97_v28, %v96_v27  ;;  %v203_v33 = vld [vmem:[#allocation7 + $0x38] sm:$0xff]  ;;  %p863_p13 = por %p862_p12, %p861_p11 }
  0x40   :  { %v715_v30 = vpack.c.bf16 %v79_v26, %v78_v25  ;;  %v80_v34 = vld [vmem:[#allocation5 + $0x30] sm:$0xff]  ;;  %v81_v35 = vld [vmem:[#allocation5 + $0x38] sm:$0xff]  ;;  %v98_v36 = vld [vmem:[#allocation5 + $0xc0] sm:$0xff]  ;;  %v747_v38 = vpack.c.bf16 %v203_v33, %v202_v31  ;;  %v1038_v22 = vshrl.u32 %v106_v21, 7 }
  0x41   :  { %742 = vmatpush3.bf16.msra.mxu1 %v741_v18  ;;  %v99_v37 = vld [vmem:[#allocation5 + $0xc8] sm:$0xff]  ;;  %v719_v39 = vpack.c.bf16 %v81_v35, %v80_v34  ;;  %v204_v40 = vld [vmem:[#allocation7 + $0x40] sm:$0xff]  ;;  %v100_v45 = vld [vmem:[#allocation5 + $0xd0] sm:$0xff]  ;;  %p864_p0 = pnand %p863_p13, %p857_p10 }
  0x42   :  { %712 = vmatpush3.bf16.msra.mxu0 %v711_v19  ;;  %743 = vmatprep.subr.bf16.mxu1 %v915_v0  ;;  %v721_v41 = vpack.c.bf16 %v99_v37, %v98_v36  ;;  %v205_v42 = vld [vmem:[#allocation7 + $0x48] sm:$0xff]  ;;  %v82_v43 = vld [vmem:[#allocation5 + $0x40] sm:$0xff]  ;;  %v101_v46 = vld [vmem:[#allocation5 + $0xd8] sm:$0xff]  ;;  %v1041_v25 = vsub.s32 1, %v1038_v22 }
  0x43   :  { %714 = vmatprep.subr.bf16.mxu0 %v713_v23  ;;  %v83_v44 = vld [vmem:[#allocation5 + $0x48] sm:$0xff]  ;;  %v750_v47 = vpack.c.bf16 %v205_v42, %v204_v40  ;;  %v206_v49 = vld [vmem:[#allocation7 + $0x50] sm:$0xff]  ;;  %v725_v51 = vpack.c.bf16 %v101_v46, %v100_v45  ;;  %v207_v52 = vld [vmem:[#allocation7 + $0x58] sm:$0xff]  ;;  %v918_v23 = vmov 1966171168   ;;  %v329_v42 = vsub.s32 2, %v1038_v22 }
  0x44   :  { %v723_v48 = vpack.c.bf16 %v83_v44, %v82_v43  ;;  %v1004_v50 = vld [vmem:[#allocation2 + $0x8] sm:$0xff]  ;;  %v84_v53 = vld [vmem:[#allocation5 + $0x50] sm:$0xff]  ;;  %v85_v54 = vld [vmem:[#allocation5 + $0x58] sm:$0xff]  ;;  %v753_v57 = vpack.c.bf16 %v207_v52, %v206_v49  ;;  %v288_v24 = vunpack.c.l.s4 %v918_v23 }
  0x45   :  { %745 = vmatpush3.bf16.msra.mxu1 %v744_v29  ;;  %v102_v55 = vld [vmem:[#allocation5 + $0xe0] sm:$0xff]  ;;  %v103_v56 = vld [vmem:[#allocation5 + $0xe8] sm:$0xff]  ;;  %174 = vmatprep.mubr.f32.mxu0 %v1004_v50  ;;  %v727_v58 = vpack.c.bf16 %v85_v54, %v84_v53  ;;  %v104_v1 = vld [vmem:[#allocation5 + $0xf0] sm:$0xff]  ;;  %v1046_v29 = vsub.s32 0, %v1038_v22 }
  0x46   :  { %716 = vmatpush3.bf16.msra.mxu0 %v715_v30  ;;  %746 = vmatprep.subr.bf16.mxu1 %v915_v0  ;;  %v208_v59 = vld [vmem:[#allocation7 + $0x60] sm:$0xff]  ;;  %v729_v60 = vpack.c.bf16 %v103_v56, %v102_v55  ;;  %v209_v61 = vld [vmem:[#allocation7 + $0x68] sm:$0xff]  ;;  %v105_v2 = vld [vmem:[#allocation5 + $0xf8] sm:$0xff]  ;;  %v289_v26 = vunpack.c.0.s8 %v288_v24 }
  0x47   :  { %718 = vmatprep.subr.bf16.mxu0 %v717_v32  ;;  %v86_v62 = vld [vmem:[#allocation5 + $0x60] sm:$0xff]  ;;  %v87_v63 = vld [vmem:[#allocation5 + $0x68] sm:$0xff]  ;;  %v756_v3 = vpack.c.bf16 %v209_v61, %v208_v59  ;;  %v210_v5 = vld [vmem:[#allocation7 + $0x70] sm:$0xff]  ;;  %v733_v6 = vpack.c.bf16 %v105_v2, %v104_v1 }
  0x48   :  { %v731_v4 = vpack.c.bf16 %v87_v63, %v86_v62  ;;  %v211_v7 = vld [vmem:[#allocation7 + $0x78] sm:$0xff]  ;;  %v88_v8 = vld [vmem:[#allocation5 + $0x70] sm:$0xff]  ;;  %v195_v12 = vld [vmem:[%s1120_s1] sm:$0x3]  ;;  %v292_v28 = vsub.s32 %v289_v26, %v1038_v22 }
  0x49   :  { %748 = vmatpush3.bf16.msra.mxu1 %v747_v38  ;;  %v89_v9 = vld [vmem:[#allocation5 + $0x78] sm:$0xff]  ;;  %v759_v10 = vpack.c.bf16 %v211_v7, %v210_v5  ;;  %v1014_v13 = vld [vmem:[#allocation2] sm:$0xff]  ;;  %v1020_v15 = vld [vmem:[#allocation2 + $0x10] sm:$0xff] }
  0x4a   :  { %720 = vmatpush3.bf16.msra.mxu0 %v719_v39  ;;  %749 = vmatprep.subr.bf16.mxu1 %v915_v0  ;;  %v735_v11 = vpack.c.bf16 %v89_v9, %v88_v8  ;;  %v1016_v14 = vld [vmem:[#allocation2 + $0x18] sm:$0xff]  ;;  %v1022_v16 = vld [vmem:[#allocation2 + $0x28] sm:$0xff]  ;;  %v1032_v18 = vld [vmem:[#allocation2 + $0x30] sm:$0xff]  ;;  %v357_v8 = vand.u32 127, %v106_v21 }
  0x4b   :  { %722 = vmatprep.subr.bf16.mxu0 %v721_v41  ;;  %v1028_v17 = vld [vmem:[#allocation2 + $0x38] sm:$0xff]  ;;  %v65_v19 = vld [vmem:[%s1123_s4] sm:$0xf] }
  0x4c   :  { %v344_v20 = vrot.slane %v65_v19, 3  ;;  %v215_v27 = vrot.slane %v65_v19, %v1041_v25  ;;  %v109_v37 = vrot.slane %v65_v19, %v1046_v29  ;;  %v330_v52 = vrot.slane %v65_v19, %v329_v42 }
  0x4d   :  { %751 = vmatpush3.bf16.msra.mxu1 %v750_v47  ;;  %v1056_v24 = vsub.s32 %v357_v8, %v1038_v22 }
  0x4e   :  { %724 = vmatpush3.bf16.msra.mxu0 %v723_v48  ;;  %752 = vmatprep.subr.bf16.mxu1 %v915_v0  ;;  %761 = vpush %v344_v20 }
  0x4f   :  { %726 = vmatprep.subr.bf16.mxu0 %v725_v51 }
  0x51   :  { %754 = vmatpush3.bf16.msra.mxu1 %v753_v57 }
  0x52   :  { %728 = vmatpush3.bf16.msra.mxu0 %v727_v58  ;;  %755 = vmatprep.subr.bf16.mxu1 %v915_v0 }
  0x53   :  { %730 = vmatprep.subr.bf16.mxu0 %v729_v60 }
  0x55   :  { %757 = vmatpush3.bf16.msra.mxu1 %v756_v3 }
  0x56   :  { %732 = vmatpush3.bf16.msra.mxu0 %v731_v4  ;;  %758 = vmatprep.subr.bf16.mxu1 %v915_v0  ;;  %v1026_v0 = vld [vmem:[#allocation2 + $0x20] sm:$0xff] }
  0x57   :  { %734 = vmatprep.subr.bf16.mxu0 %v733_v6 }
  0x59   :  { %760 = vmatpush3.bf16.msra.mxu1 %v759_v10  ;;  %v362_v10 = vadd.s32 4294967288, %v357_v8 }
  0x5a   :  { %736 = vmatpush3.bf16.msra.mxu0 %v735_v11 }
  0x5b   :  { %v1053_v20 = vsub.s32 %v362_v10, %v1038_v22 }
  0x5c   :  { %703 = vmatmul.mubr.f32.vlgmr.msra.gmra.mrb[0].mxu1 %v195_v12 }
  0x5d   :  { %175 = vmatmul.mubr.f32.vlgmr.msra.gmra.mrb[0].mxu0 %v1014_v13 }
  0x5e   :  { %179 = vmatprep.mubr.f32.mxu0 %v1016_v14 }
  0x61   :  { %180 = vmatmul.mubr.f32.gmra.mrb[2].mxu0 %v1020_v15 }
  0x62   :  { %184 = vmatprep.mubr.f32.mxu0 %v1022_v16 }
  0x65   :  { %185 = vmatmul.mubr.f32.gmra.mrb[4].mxu0 %v1026_v0 }
  0x66   :  { %189 = vmatprep.mubr.f32.mxu0 %v1028_v17 }
  0x69   :  { %190 = vmatmul.mubr.f32.gmra.mrb[6].mxu0 %v1032_v18 }
  0x7f   :  { %s762_s4 = spop %761 }
  0x80   :  { %v346_v12 = vstv %s762_s4 }
 0x12f   :  { %v282_v30 = vpop.f32.mrb[0].mxu1 }
 0x130   :  { %v641_v31 = vpop.f32.mrb[0].mxu0  ;;  %v283_v32 = vadd.f32 %v282_v30, %v215_v27  ;;  %v704_v34 = vpop.f32.mrb[1].mxu1 }
 0x131   :  { %v642_v33 = vpop.f32.mrb[1].mxu0 }
 0x132   :  { %v643_v35 = vadd.f32 %v642_v33, %v641_v31  ;;  %v293_v36 = vrot.slane %v283_v32, %v292_v28 }
 0x134   :  { %v644_v38 = vpop.f32.mrb[2].mxu0  ;;  %v294_v39 = vcombine.high %v293_v36, %v293_v36  ;;  %v301_v40 = vrot.slane %v293_v36, %v292_v28  ;;  %v177_v44 = vadd.f32 %v643_v35, %v109_v37 }
 0x135   :  { %v645_v41 = vpop.f32.mrb[3].mxu0 }
 0x136   :  { %v646_v43 = vadd.f32 %v645_v41, %v644_v38  ;;  %v312_v45 = vrot.slane %v301_v40, %v1046_v29  ;;  %v308_v46 = vrot.slane %v294_v39, %v292_v28  ;;  %v919_v38 = vmov 0  }
 0x137   :  { %779 = vset.pattern.permute.xlu0 %v919_v38  ;;  %778 = vset.pattern.permute.xlu1 %v919_v38 }
 0x138   :  { %v182_v47 = vadd.f32 %v646_v43, %v109_v37  ;;  %v647_v48 = vpop.f32.mrb[4].mxu0  ;;  %v319_v51 = vadd.f32 %v312_v45, %v177_v44  ;;  %v316_v55 = vrot.slane %v308_v46, %v1046_v29 }
 0x139   :  { %v648_v49 = vpop.f32.mrb[5].mxu0 }
 0x13a   :  { %v649_v53 = vadd.f32 %v648_v49, %v647_v48  ;;  %v320_v54 = vadd.f32 %v312_v45, %v182_v47  ;;  %v323_v56 = vmax.f32 %v319_v51, 0.0 }
 0x13c   :  { %v187_v57 = vadd.f32 %v649_v53, %v109_v37  ;;  %v650_v58 = vpop.f32.mrb[6].mxu0  ;;  %v331_v60 = vmul.f32 %v330_v52, %v323_v56  ;;  %v324_v61 = vmax.f32 %v320_v54, 0.0 }
 0x13d   :  { %v651_v59 = vpop.f32.mrb[7].mxu0 }
 0x13e   :  { %v652_v62 = vadd.f32 %v651_v59, %v650_v58  ;;  %v321_v63 = vadd.f32 %v316_v55, %v187_v57  ;;  %335 = vadd.xlane.f32.xlu0 %v331_v60  ;;  %v332_v3 = vmul.f32 %v330_v52, %v324_v61 }
 0x140   :  { %v192_v1 = vadd.f32 %v652_v62, %v109_v37  ;;  %v325_v2 = vmax.f32 %v321_v63, 0.0 }
 0x142   :  { %v333_v4 = vmul.f32 %v330_v52, %v325_v2  ;;  %v322_v5 = vadd.f32 %v316_v55, %v192_v1  ;;  %337 = vadd.xlane.f32.xlu0 %v332_v3 }
 0x144   :  { %339 = vadd.xlane.f32.xlu1 %v333_v4  ;;  %v326_v6 = vmax.f32 %v322_v5, 0.0 }
 0x146   :  { %v334_v7 = vmul.f32 %v330_v52, %v326_v6 }
 0x148   :  { %341 = vadd.xlane.f32.xlu1 %v334_v7 }
 0x1cb   :  { %v336_v9 = vpop.xlane.xlu0 %335 }
 0x1cc   :  { %v348_v26 = vadd.f32 %v346_v12, %v336_v9 }
 0x1ce   :  { %v361_v21 = vrot.slane %v348_v26, %v1056_v24 }
 0x1cf   :  { %v338_v11 = vpop.xlane.xlu0 %337 }
 0x1d0   :  { %v349_v23 = vadd.f32 %v346_v12, %v338_v11 }
 0x1d1   :  { %v340_v19 = vpop.xlane.xlu1 %339 }
 0x1d2   :  { %v350_v27 = vadd.f32 %v346_v12, %v340_v19  ;;  %v366_v30 = vrot.slane %v349_v23, %v1053_v20 }
 0x1d4   :  { %v372_v32 = vrot.slane %v350_v27, %v1056_v24  ;;  %v368_v34 = vsel %vm367_vm1, %v366_v30, %v361_v21 }
 0x1d5   :  { %v342_v28 = vpop.xlane.xlu1 %341 }
 0x1d6   :  { %v351_v31 = vadd.f32 %v346_v12, %v342_v28 }
 0x1d8   :  { %v376_v33 = vrot.slane %v351_v31, %v1053_v20 }
 0x1da   :  { %v377_v35 = vsel %vm367_vm1, %v376_v33, %v372_v32 }
 0x1db   :  { %v379_v36 = vsel %vm378_vm2, %v377_v35, %v368_v34 }
 0x1dc   :  { %v382_v37 = vsel %vm381_vm3, %v379_v36, -inf }
 0x1dd   :  { %383 = vmax.xlane.f32.xlu0 %v382_v37 }
 0x26a   :  { %v384_v39 = vpop.xlane.xlu0 %383 }
 0x26b   :  { %v389_v40 = vrot.slane %v384_v39, %v1046_v29  ;;  %v393_v41 = vrot.slane %v384_v39, %v1041_v25 }
 0x26d   :  { %v396_v42 = vsub.f32 %v348_v26, %v389_v40  ;;  %v397_v43 = vsub.f32 %v349_v23, %v389_v40  ;;  %v398_v44 = vsub.f32 %v350_v27, %v393_v41  ;;  %v399_v47 = vsub.f32 %v351_v31, %v393_v41 }
 0x26f   :  { %v400_v45 = vmul.f32 1.442695, %v396_v42  ;;  %v402_v46 = vmul.f32 1.442695, %v397_v43  ;;  %v404_v48 = vmul.f32 1.442695, %v398_v44 }
 0x270   :  { %v406_v49 = vmul.f32 1.442695, %v399_v47 }
 0x271   :  { %780 = vpow2.f32 %v400_v45 }
 0x272   :  { %782 = vpow2.f32 %v402_v46 }
 0x273   :  { %784 = vpow2.f32 %v404_v48  ;;  %v921_v48 = vmov 1983009808  }
 0x274   :  { %786 = vpow2.f32 %v406_v49  ;;  %v551_v49 = vunpack.c.l.s4 %v921_v48 }
 0x27b   :  { %v781_v51 = vpop.eup %780 }
 0x27c   :  { %v783_v52 = vpop.eup %782  ;;  %413 = vperm.xlu1 %778, %v781_v51  }
 0x27d   :  { %416 = vperm.xlu0 %779, %v783_v52   ;;  %v785_v53 = vpop.eup %784 }
 0x27e   :  { %v787_v54 = vpop.eup %786 }
 0x280   :  { %419 = vperm.xlu1 %778, %v785_v53  }
 0x284   :  { %422 = vperm.xlu1 %778, %v787_v54  }
 0x2fb   :  { %v414_v55 = vpop.permute.xlu1 %413 }
 0x2fc   :  { %v417_v56 = vpop.permute.xlu0 %416  ;;  %v427_v59 = vrot.slane %v414_v55, %v1056_v24 }
 0x2fd   :  { %v431_v58 = vrot.slane %v417_v56, %v1053_v20 }
 0x2ff   :  { %v420_v57 = vpop.permute.xlu1 %419  ;;  %v432_v63 = vsel %vm367_vm1, %v431_v58, %v427_v59 }
 0x300   :  { %v436_v61 = vrot.slane %v420_v57, %v1056_v24 }
 0x303   :  { %v423_v60 = vpop.permute.xlu1 %422 }
 0x304   :  { %v440_v62 = vrot.slane %v423_v60, %v1053_v20 }
 0x306   :  { %v441_v1 = vsel %vm367_vm1, %v440_v62, %v436_v61 }
 0x307   :  { %v442_v2 = vsel %vm378_vm2, %v441_v1, %v432_v63 }
 0x308   :  { %v444_v3 = vsel %vm381_vm3, %v442_v2, 0.0 }
 0x309   :  { %445 = vadd.xlane.f32.xlu1 %v444_v3 }
 0x396   :  { %v446_v4 = vpop.xlane.xlu1 %445 }
 0x397   :  { %788 = vrcp.f32 %v446_v4 }
 0x3a1   :  { %v789_v5 = vpop.eup %788 }
 0x3a2   :  { %v448_v6 = vmul.f32 %v789_v5, %v446_v4 }
 0x3a4   :  { %v449_v7 = vsub.f32 2.0, %v448_v6 }
 0x3a6   :  { %v450_v8 = vmul.f32 %v789_v5, %v449_v7 }
 0x3a8   :  { %v459_v9 = vrot.slane %v450_v8, %v1041_v25  ;;  %v455_v11 = vrot.slane %v450_v8, %v1046_v29 }
 0x3aa   :  { %v464_v10 = vmul.f32 %v785_v53, %v459_v9  ;;  %v465_v12 = vmul.f32 %v787_v54, %v459_v9  ;;  %v462_v19 = vmul.f32 %v781_v51, %v455_v11  ;;  %v463_v23 = vmul.f32 %v783_v52, %v455_v11 }
 0x3ac   :  { %477 = vperm.xlu0 %779, %v464_v10  }
 0x3b0   :  { %480 = vperm.xlu0 %779, %v465_v12  }
 0x3b4   :  { %471 = vperm.xlu0 %779, %v462_v19  }
 0x3b8   :  { %474 = vperm.xlu0 %779, %v463_v23  }
 0x42b   :  { %v478_v26 = vpop.permute.xlu0 %477 }
 0x42c   :  { %v513_v28 = vmul.f32 %v478_v26, %v1026_v0  ;;  %v514_v30 = vmul.f32 %v478_v26, %v1022_v16  ;;  %v494_v38 = vrot.slane %v478_v26, %v1056_v24 }
 0x42f   :  { %v481_v27 = vpop.permute.xlu0 %480 }
 0x430   :  { %v515_v31 = vmul.f32 %v481_v27, %v1032_v18  ;;  %v516_v25 = vmul.f32 %v481_v27, %v1028_v17  ;;  %v498_v35 = vrot.slane %v481_v27, %v1053_v20 }
 0x432   :  { %v531_v21 = vadd.f32 %v515_v31, %v513_v28  ;;  %v538_v32 = vadd.f32 %v516_v25, %v514_v30  ;;  %v499_v44 = vsel %vm367_vm1, %v498_v35, %v494_v38 }
 0x433   :  { %v472_v33 = vpop.permute.xlu0 %471 }
 0x434   :  { %v532_v29 = vrot.slane %v531_v21, 4  ;;  %v539_v34 = vrot.slane %v538_v32, 4  ;;  %v485_v39 = vrot.slane %v472_v33, %v1056_v24  ;;  %v509_v0 = vmul.f32 %v472_v33, %v1014_v13 }
 0x435   :  { %v510_v42 = vmul.f32 %v472_v33, %v1004_v50 }
 0x436   :  { %v533_v36 = vadd.f32 %v532_v29, %v531_v21  ;;  %v540_v37 = vadd.f32 %v539_v34, %v538_v32 }
 0x437   :  { %v475_v16 = vpop.permute.xlu0 %474 }
 0x438   :  { %v534_v40 = vrot.slane %v533_v36, 2  ;;  %v541_v18 = vrot.slane %v540_v37, 2  ;;  %v489_v17 = vrot.slane %v475_v16, %v1053_v20  ;;  %v511_v41 = vmul.f32 %v475_v16, %v1020_v15 }
 0x439   :  { %v512_v43 = vmul.f32 %v475_v16, %v1016_v14 }
 0x43a   :  { %v535_v45 = vadd.f32 %v534_v40, %v533_v36  ;;  %v542_v24 = vadd.f32 %v541_v18, %v540_v37  ;;  %v517_v46 = vadd.f32 %v511_v41, %v509_v0  ;;  %v490_v13 = vsel %vm367_vm1, %v489_v17, %v485_v39 }
 0x43b   :  { %v524_v47 = vadd.f32 %v512_v43, %v510_v42  ;;  %v500_v20 = vsel %vm378_vm2, %v499_v44, %v490_v13 }
 0x43c   :  { %v536_v15 = vrot.slane %v535_v45, 1  ;;  %v543_v51 = vrot.slane %v542_v24, 1  ;;  %v518_v52 = vrot.slane %v517_v46, 4  ;;  %v503_v50 = vsel %vm502_vm4, %v500_v20, 0.0 }
 0x43d   :  { %v525_v53 = vrot.slane %v524_v47, 4  ;;  %504 = vst [vmem:[#allocation9] sm:$0x3] %v503_v50 }
 0x43e   :  { %v519_v14 = vadd.f32 %v518_v52, %v517_v46 }
 0x43f   :  { %867 = shalt.err (!%p864_p0)
}
 0x440   :  { %s868_s18 = scalar_lea.hbm %s1125_s6, 32 }
 0x441   :  { %p869_p1 = scmp.ne.s32.totalorder %s1125_s6, %s868_s18  ;;  %p872_p2 = scmp.lt.u32.totalorder %s868_s18, %s1125_s6 }
 0x443   :  { %p874_p3 = pnand %p872_p2, %p869_p1 }
 0x445   :  { %877 = shalt.err (!%p874_p3)
}
 0x446   :  { %598 = dma.vmem_to_hbm [thread:$0]  %s596_s14, 32, %s1125_s6, [#allocation10]   ;;  %v537_v54 = vadd.f32 %v536_v15, %v535_v45  ;;  %v544_v55 = vadd.f32 %v543_v51, %v542_v24  ;;  %v526_v56 = vadd.f32 %v525_v53, %v524_v47  ;;  %v552_v57 = vunpack.c.0.s8 %v551_v49 }
 0x447   :  { %v520_v58 = vrot.slane %v519_v14, 2  ;;  %vm571_vm5 = vcmask 1043459   ;;  %vm573_vm6 = vcmask 1045509   ;;  %s922_s6 = smov [#allocation8]   ;;  %vm575_vm7 = vcmask 1047559  }
 0x448   :  { %v527_v59 = vrot.slane %v526_v56, 2  ;;  %v555_v62 = vsub.s32 %v552_v57, %v1038_v22  ;;  %v557_v63 = vcombine.low %v537_v54, %v544_v55  ;;  %s585_s24 = sshll.u32 %s922_s6, 4  ;;  %s586_s24 = int_to_ptr.vmem [resolvable:$true] %s585_s24 }
 0x449   :  { %v521_v60 = vadd.f32 %v520_v58, %v519_v14  ;;  %s878_s25 = scalar_lea.vmem %s586_s24, 64  ;;  %p883_p5 = scmp.lt.s32.totalorder %s586_s24, %s586_s24 }
 0x44a   :  { %v528_v61 = vadd.f32 %v527_v59, %v526_v56  ;;  %v564_v5 = vrot.slane %v557_v63, %v555_v62  ;;  %p879_p4 = scmp.ne.s32.totalorder %s586_s24, %s878_s25  ;;  %p884_p6 = scmp.lt.s32.totalorder %s878_s25, %s878_s25 }
 0x44b   :  { %v522_v1 = vrot.slane %v521_v60, 1 }
 0x44c   :  { %v529_v2 = vrot.slane %v528_v61, 1  ;;  %v569_v8 = vrot.slane %v564_v5, 7  ;;  %p885_p7 = por %p884_p6, %p883_p5 }
 0x44d   :  { %v523_v3 = vadd.f32 %v522_v1, %v521_v60 }
 0x44e   :  { %v530_v4 = vadd.f32 %v529_v2, %v528_v61  ;;  %p886_p8 = pnand %p885_p7, %p879_p4 }
 0x450   :  { %v549_v6 = vcombine.low %v523_v3, %v530_v4 }
 0x452   :  { %v556_v7 = vrot.slane %v549_v6, %v555_v62 }
 0x454   :  { %v570_v9 = vsel %vm378_vm2, %v569_v8, %v556_v7 }
 0x455   :  { %v572_v10 = vsel %vm571_vm5, %v569_v8, %v570_v9 }
 0x456   :  { %v574_v11 = vsel %vm573_vm6, %v569_v8, %v572_v10 }
 0x457   :  { %v576_v22 = vsel %vm575_vm7, %v569_v8, %v574_v11 }
 0x458   :  { %578 = vst [vmem:[#allocation8] sm:$0xf] %v576_v22 }
 0x459   :  { %889 = shalt.err (!%p886_p8)
}
 0x45a   :  { %s890_s28 = scalar_lea.hbm %s1124_s5, 64 }
 0x45b   :  { %p891_p9 = scmp.ne.s32.totalorder %s1124_s5, %s890_s28  ;;  %p894_p10 = scmp.lt.u32.totalorder %s890_s28, %s1124_s5 }
 0x45d   :  { %p896_p11 = pnand %p894_p10, %p891_p9 }
 0x45f   :  { %899 = shalt.err (!%p896_p11)
}
 0x460   :  { %588 = dma.vmem_to_hbm [thread:$0]  %s586_s24, 64, %s1124_s5, [#allocation4]  }
 0x461   :  { %904 = dma.done.wait [#allocation4], 64  }
 0x462   :  { %905 = vsyncadd [#allocation4], 4294967232 }
 0x463   :  { %906 = dma.done.wait [#allocation10], 32  }
 0x464   :  { %907 = vsyncadd [#allocation10], 4294967264 }
 0x465   :  { %605 = vsyncpa [#allocation3], 1 }
 0x466   :  { %606 = vsyncpa [#allocation6], 1 }
 0x467   :  { %607 = vsyncpa [#allocation4], 1 }
 0x468   :  { %608 = vsyncpa [#allocation10], 1 }

</bundles_post_ra>
